<compile_context>
chip_gen: v7x
topology: tpu7x:2x2x1
jax: 0.10.0
libtpu: 0.0.40
codegen_flags: <defaults>
</compile_context>

<pallas_src>
import math
import jax
import jax.numpy as jnp
from jax.experimental import pallas as pl
from jax.experimental.pallas import tpu as pltpu


def _graphsage_head_kernel(w_ref, e_ref, et_ref, s_ref):
    # w_ref : (C, D)   resident classifier weight
    # e_ref : (D, tn)  node-tile of encoder embeddings (PyTorch layout)
    # et_ref: (tn, D)  block of embeds.t()              (lane-dense, D >= 128)
    # s_ref : (C, tn)  block of scores in (C, N) layout (lane-dense, tn >= 128)
    e = e_ref[...]                                    # (D, tn)
    # Scores block on the MXU: (C, D) @ (D, tn) -> (C, tn).
    # No weight transpose and no dependency on the embeds transpose below,
    # so MXU push and the XLU transpose overlap.
    s_ref[...] = jnp.dot(
        w_ref[...], e, preferred_element_type=jnp.float32
    ).astype(s_ref.dtype)
    # embeds.t() block: XLU transpose, stored lane-dense.
    et_ref[...] = e.T.astype(et_ref.dtype)


def _pick_node_tile(N, tn):
    """Lane-align tn; keep >=2 grid steps when N allows (v7x megacore)."""
    tn = max(128, (int(tn) // 128) * 128)
    if N >= 2 * 128 and pl.cdiv(N, tn) < 2:
        # shrink so the parallel grid axis has at least 2 steps
        tn = max(128, (pl.cdiv(N, 2) // 128) * 128)
    return tn


def supervised_graphsage_forward(weight, embeds, *, tn=512):
    """weight: (C, D) f32, embeds: (D, N) f32 -> (embeds_t (N, D), scores_t (N, C)).

    `tn` is the node-tile width (sweep 512-2048; it is a benchmark parameter).
    """
    C, D = weight.shape
    D2, N = embeds.shape
    assert D == D2

    tn = _pick_node_tile(N, tn)
    grid = (pl.cdiv(N, tn),)

    out_shapes = (
        jax.ShapeDtypeStruct((N, D), jnp.float32),  # embeds.t()
        jax.ShapeDtypeStruct((C, N), jnp.float32),  # scores, (C, N) layout
    )
    embeds_t, scores_cn = pl.pallas_call(
        _graphsage_head_kernel,
        out_shape=out_shapes,
        grid_spec=pltpu.PrefetchScalarGridSpec(
            num_scalar_prefetch=0,
            grid=grid,
            in_specs=[
                pl.BlockSpec((C, D), lambda i: (0, 0)),   # weight, resident
                pl.BlockSpec((D, tn), lambda i: (0, i)),  # embeds node-tile
            ],
            out_specs=[
                pl.BlockSpec((tn, D), lambda i: (i, 0)),  # embeds.t() tile
                pl.BlockSpec((C, tn), lambda i: (0, i)),  # lane-dense scores tile
            ],
        ),
        compiler_params=pltpu.CompilerParams(
            dimension_semantics=("parallel",),
        ),
    )(weight, embeds)

    # Tiny (C, N) -> (N, C) transpose done once in XLA (negligible vs HBM traffic).
    return embeds_t, scores_cn.T


def xavier_uniform(key, shape, dtype=jnp.float32):
    # torch.nn.init.xavier_uniform_ for a 2-D tensor (fan_out, fan_in) = shape
    fan_out, fan_in = shape
    bound = math.sqrt(6.0 / (fan_in + fan_out))
    return jax.random.uniform(key, shape, dtype, minval=-bound, maxval=bound)


if __name__ == "__main__":
    num_classes = 8     # small label set
    embed_dim = 128     # enc.embed_dim
    num_nodes = 1024    # len(nodes); grid of 2 node-tiles at tn=512

    key = jax.random.PRNGKey(0)
    k_w, k_e = jax.random.split(key)

    # Parameter: self.weight (num_classes, embed_dim), xavier-uniform init.
    weight = xavier_uniform(k_w, (num_classes, embed_dim))
    # Synthetic encoder output, PyTorch layout (embed_dim, num_nodes).
    embeds = jax.random.normal(k_e, (embed_dim, num_nodes), dtype=jnp.float32)

    embeds_t, scores_t = supervised_graphsage_forward(weight, embeds, tn=512)
    jax.block_until_ready((embeds_t, scores_t))

    # Reference check against plain JAX.
    ref_scores_t = (weight @ embeds).T
    assert embeds_t.shape == (num_nodes, embed_dim)
    assert scores_t.shape == (num_nodes, num_classes)
    assert jnp.allclose(embeds_t, embeds.T, atol=1e-6)
    assert jnp.allclose(scores_t, ref_scores_t, atol=1e-4, rtol=1e-4)

    print("KERNEL_OK")
</pallas_src>

<mosaic_0001>
module attributes {stable_mosaic.version = 11 : i64} {
  func.func @_graphsage_head_kernel(%arg0: i32, %arg1: memref<8x128xf32, #tpu.memory_space<vmem>>, %arg2: memref<128x512xf32, #tpu.memory_space<vmem>>, %arg3: memref<512x128xf32, #tpu.memory_space<vmem>>, %arg4: memref<8x512xf32, #tpu.memory_space<vmem>>) attributes {dimension_semantics = [#tpu.dimension_semantics<parallel>], iteration_bounds = array<i64: 2>, scalar_prefetch = 0 : i64, scratch_operands = 0 : i64, tpu.core_type = #tpu.core_type<tc>, window_params = [{pipeline_mode = #tpu.pipeline_mode<synchronous>, transform_indices = @transform_0, window_bounds = array<i64: 8, 128>}, {transform_indices = @transform_1, window_bounds = array<i64: 128, 512>}, {transform_indices = @transform_2, window_bounds = array<i64: 512, 128>}, {transform_indices = @transform_3, window_bounds = array<i64: 8, 512>}]} {
    %c0 = arith.constant 0 : index
    %c0_0 = arith.constant 0 : index
    %0 = vector.load %arg2[%c0, %c0_0] : memref<128x512xf32, #tpu.memory_space<vmem>>, vector<128x512xf32>
    %c0_1 = arith.constant 0 : index
    %c0_2 = arith.constant 0 : index
    %1 = vector.load %arg1[%c0_1, %c0_2] : memref<8x128xf32, #tpu.memory_space<vmem>>, vector<8x128xf32>
    %cst = arith.constant dense<0.000000e+00> : vector<8x512xf32>
    %2 = tpu.matmul %1, %0, %cst {dimension_numbers = #tpu.dot_dimension_numbers<[1], [0], [0], [1], [0, 0, 1, 1], [], []>} : vector<8x128xf32>, vector<128x512xf32>, vector<8x512xf32> -> vector<8x512xf32>
    %c0_3 = arith.constant 0 : index
    %c0_4 = arith.constant 0 : index
    %3 = vector.load %arg4[%c0_3, %c0_4] : memref<8x512xf32, #tpu.memory_space<vmem>>, vector<8x512xf32>
    tpu.vector_store %arg4[%c0_3, %c0_4], %2 {strides = array<i32>} : memref<8x512xf32, #tpu.memory_space<vmem>>, vector<8x512xf32>,
    %4 = tpu.transpose %0, [1, 0] : vector<128x512xf32> -> vector<512x128xf32>
    %c0_5 = arith.constant 0 : index
    %c0_6 = arith.constant 0 : index
    %5 = vector.load %arg3[%c0_5, %c0_6] : memref<512x128xf32, #tpu.memory_space<vmem>>, vector<512x128xf32>
    tpu.vector_store %arg3[%c0_5, %c0_6], %4 {strides = array<i32>} : memref<512x128xf32, #tpu.memory_space<vmem>>, vector<512x128xf32>,
    return
  }
  func.func @transform_0(%arg0: i32) -> (i32, i32) {
    %c0_i32 = arith.constant 0 : i32
    %c0_i32_0 = arith.constant 0 : i32
    %c0_i32_1 = arith.constant 0 : i32
    return %c0_i32, %c0_i32_0 : i32, i32
  }
  func.func @transform_1(%arg0: i32) -> (i32, i32) {
    %c0_i32 = arith.constant 0 : i32
    %c0_i32_0 = arith.constant 0 : i32
    return %c0_i32, %arg0 : i32, i32
  }
  func.func @transform_2(%arg0: i32) -> (i32, i32) {
    %c0_i32 = arith.constant 0 : i32
    %c0_i32_0 = arith.constant 0 : i32
    return %arg0, %c0_i32 : i32, i32
  }
  func.func @transform_3(%arg0: i32) -> (i32, i32) {
    %c0_i32 = arith.constant 0 : i32
    %c0_i32_0 = arith.constant 0 : i32
    return %c0_i32, %arg0 : i32, i32
  }
}

</mosaic_0001>

<bundles_post_ra>
// kernel: tpu_custom_call.1
= control target key start
LH: loop header
LB: loop body
LE: loop exit
PB: predicated region body
PF: predicated region fallthrough
CT: control target
= control target key end

     0   :  { %9 = vsyncpa [#allocation3], 0  ;;  %s1654_s0 = inlined_call_operand.hbm [shape: f32[8,128], index: 0, kind: input, shape index: {}]   ;;  %s1655_s1 = inlined_call_operand.hbm [shape: f32[128,1024], index: 1, kind: input, shape index: {}]   ;;  %s1656_s2 = inlined_call_operand.hbm [shape: f32[1024,128], index: 2, kind: output, shape index: {0}]   ;;  %s1657_s3 = inlined_call_operand.hbm [shape: f32[8,1024], index: 3, kind: output, shape index: {1}]  }
   0x1   :  { %10 = vsyncpa [#allocation6], 0 }
   0x2   :  { %12 = vsyncpa [#allocation6 + $0x1], 0 }
   0x3   :  { %13 = vsyncpa [#allocation4], 0 }
   0x4   :  { %15 = vsyncpa [#allocation4 + $0x1], 0 }
   0x5   :  { %16 = vsyncpa [#allocation9], 0 }
   0x6   :  { %18 = vsyncpa [#allocation9 + $0x1], 0  ;;  %s1116_s12 = smov 0   ;;  %s1118_s13 = smov 0  }
   0x7   :  { %s1120_s14 = smov 0   ;;  %s1122_s15 = smov 0  }
   0x8 LB: > { %s1137_s16 = sadd.s32 4294967295, %s1084_s15   ;;  %s769_s17 = sadd.s32 4294967294, %s1084_s15   ;;  %s1084_s15 = sphi %s1122_s15, %s1682_s15   ;;  %s1080_s14 = sphi %s1120_s14, %s1681_s14   ;;  %s1076_s13 = sphi %s1118_s13, %s1680_s13   ;;  %s1072_s12 = sphi %s1116_s12, %s1679_s12  }
   0x9   : > { %s1141_s18 = sadd.s32 1, %s1084_s15   ;;  %s52_s19 = sadd.s32 1, %s1080_s14 }
   0xa   : > { %s49_s20 = ssub.s32 %s1084_s15, %s1141_s18  ;;  %p59_p0 = scmp.ne.s32.totalorder %s1080_s14, %s1076_s13 }
   0xb   : > { %p50_p1 = scmp.eq.s32.totalorder %s49_s20, 0  ;;  %p60_p2 = scmp.eq.s32.totalorder %s1084_s15, 0 }
   0xc   : > { %p65_p3 = scmp.ne.s32.totalorder %s1076_s13, %s1072_s12  ;;  %p1658_p4 = scmp.eq.s32.totalorder %s1137_s16, 0 }
   0xd   : > { %s1153_s21 = scalar_select %p50_p1, %s1080_s14, %s52_s19  }
   0xe   : > { %p1155_p5 = por %p60_p2, %p59_p0  ;;  %p1161_p6 = por %p1658_p4, %p65_p3 }
   0xf   : > { %p89_p7 = scmp.eq.s32.totalorder %s1137_s16, 1  ;;  %p95_p8 = scmp.eq.s32.totalorder %s769_s17, 1 }
  0x10   : > { %s1664_s23 = scalar_select %p1161_p6, 1, 0 }
  0x11   : > { %p770_p9 = scmp.ge.s32.totalorder %s1084_s15, 1  ;;  %p128_p10 = scmp.lt.s32.totalorder %s1084_s15, 3 }
  0x12   : > { %p1168_p11 = por %p89_p7, %p59_p0  ;;  %p1172_p12 = por %p95_p8, %p65_p3 }
  0x13   : > { %p1176_p13 = pnand %p770_p9, %p128_p10  ;;  %s1086_s27 = smov [#allocation2]  }
  0x14   : > { %s1665_s24 = scalar_select %p1168_p11, 1, 0 }
  0x15   : > { %s1666_s25 = scalar_select %p1172_p12, 1, 0 }
  0x16   : > { %s1667_s26 = scalar_select %p1176_p13, 1, 0 }
  0x17   : > { %p866_p2 = pneg %p1176_p13  ;;  %s141_s28 = sshll.u32 %s1086_s27, 4  ;;  %s142_s28 = int_to_ptr.vmem [resolvable:$true] %s141_s28 }
  0x18   : > { %p882_p4 = scmp.lt.s32.totalorder %s1084_s15, 2  ;;  %p1668_p0 = scmp.eq.s32.totalorder %s1137_s16, 0 }
  0x19   : > { %s152_s30 = sand.u32 1, %s1080_s14   ;;  %s924_s8 = scalar_lea.hbm %s1654_s0, 128 }
  0x1a   : > { %p1186_p7 = pnand %p866_p2, %p1668_p0  ;;  %p1193_p3 = pnand %p882_p4, %p1155_p5 }
  0x1b   : > { %s773_s5 = sshll.u32 %s152_s30, 9  ;;  %p925_p8 = scmp.ne.s32.totalorder %s1654_s0, %s924_s8 }
  0x1c   : > { %s1670_s4 = scalar_select %p1193_p3, 1, 0 }
  0x1d   : > { %p926_p9 = pneg %p1186_p7  ;;  %p931_p4 = scmp.lt.u32.totalorder %s924_s8, %s1654_s0 }
  0x1f   : > { %p927_p10 = pnand %p926_p9, %p925_p8 }
  0x21   : > { %p928_p2 = pneg %p927_p10 }
  0x23   : > { %p933_p5 = pnand %p931_p4, %p928_p2 }
  0x25   : > { %936 = shalt.err (!%p933_p5)
}
  0x26   : > { %s937_s19 = scalar_lea.vmem %s142_s28, 128  ;;  %p945_p11 = scmp.lt.s32.totalorder %s142_s28, %s142_s28 }
  0x27   : > { %p938_p0 = scmp.ne.s32.totalorder %s142_s28, %s937_s19  ;;  %p946_p6 = scmp.lt.s32.totalorder %s937_s19, %s937_s19 }
  0x29   : > { %p940_p1 = pnand %p938_p0, %p926_p9  ;;  %p947_p13 = por %p946_p6, %p945_p11 }
  0x2b   : > { %p941_p12 = pneg %p940_p1 }
  0x2d   : > { %p948_p3 = pnand %p947_p13, %p941_p12 }
  0x2f   : > { %951 = shalt.err (!%p948_p3)
}
  0x30   : > { %869 = dma.hbm_to_vmem [thread:$0]  (!%p1186_p7), %s1654_s0, 128, %s142_s28, [#allocation3]  }
  0x31   : > { %s789_s27 = sshll.u32 %s1084_s15, 9  ;;  %s156_s6 = scalar_lea.vmem [#allocation5], %s773_s5 }
  0x32   : > { %s163_s7 = sshll.u32 %s156_s6, 4  ;;  %s1217_s10 = scalar_lea.hbm %s1655_s1, %s789_s27  ;;  %s1219_s7 = int_to_ptr.vmem [resolvable:$true] %s163_s7 }
  0x33   : > { %s1221_s29 = scalar_lea.sflag [#allocation6], %s152_s30  ;;  %s952_s11 = scalar_lea.hbm %s1217_s10, 8192 }
  0x34   : > { %p953_p6 = scmp.ne.s32.totalorder %s1217_s10, %s952_s11  ;;  %p1671_p11 = scmp.ne.s32.totalorder %s1670_s4, 0 }
  0x35   : > { %s957_s17 = scalar_lea.hbm %s1655_s1, 16384  ;;  %p958_p7 = scmp.lt.u32.totalorder %s1217_s10, %s1655_s1 }
  0x36   : > { %p954_p12 = pneg %p1671_p11  ;;  %p959_p3 = scmp.lt.u32.totalorder %s957_s17, %s952_s11 }
  0x37   : > { %p961_p9 = scmp.lt.u32.totalorder %s952_s11, %s1217_s10 }
  0x38   : > { %p955_p13 = pnand %p954_p12, %p953_p6  ;;  %p960_p8 = por %p959_p3, %p958_p7 }
  0x3a   : > { %p956_p1 = pneg %p955_p13  ;;  %p962_p10 = por %p961_p9, %p960_p8 }
  0x3c   : > { %p963_p2 = pnand %p962_p10, %p956_p1 }
  0x3e   : > { %966 = shalt.err (!%p963_p2)
}
  0x3f   : > { %s967_s30 = scalar_lea.vmem %s1219_s7, 8192  ;;  %s1087_s22 = smov [#allocation5]  }
  0x40   : > { %p968_p4 = scmp.ne.s32.totalorder %s1219_s7, %s967_s30  ;;  %s972_s27 = sshll.u32 %s1087_s22, 4  ;;  %s973_s27 = int_to_ptr.vmem [resolvable:$false] %s972_s27 }
  0x41   : > { %s974_s6 = scalar_lea.vmem %s973_s27, 16384  ;;  %p975_p6 = scmp.lt.s32.totalorder %s1219_s7, %s973_s27 }
  0x42   : > { %p970_p5 = pnand %p968_p4, %p954_p12  ;;  %p976_p13 = scmp.lt.s32.totalorder %s974_s6, %s967_s30 }
  0x44   : > { %p971_p0 = pneg %p970_p5  ;;  %p977_p7 = por %p976_p13, %p975_p6 }
  0x46   : > { %p978_p3 = pnand %p977_p7, %p971_p0 }
  0x48   : > { %981 = shalt.err (!%p978_p3)
}
  0x49   : > { %s1088_s8 = smov 1024   ;;  %s1089_s9 = smov 512  }
  0x4a   : > { %s1090_s11 = smov 32   ;;  %p1672_p12 = scmp.ne.s32.totalorder %s1667_s26, 0 }
  0x4b   : > { %873 = dma.hbm_to_vmem [thread:$0]  (!%p1671_p11), %s1217_s10, 8192, %s1219_s7, %s1221_s29, %s1088_s8, %s1089_s9, %s1090_s11  }
  0x4c   : > { %175 = sbr.rel (%p1672_p12) target bundleno = 380 (0x17c), region = 28  ;;  %p1673_p1 = scmp.eq.s32.totalorder (!%p1672_p12), %s1137_s16, 0 }
  0x53   : > { %1055 = dma.done.wait (%p1673_p1), [#allocation3], 128   ;;  %p1674_p8 = pmov %p1673_p1 }
  0x54   : > { %s1256_s28 = sand.u32 1, %s1076_s13   ;;  %p1675_p11 = scmp.ne.s32.totalorder %s1664_s23, 0 }
  0x55   : > { %1057 = vsyncadd (%p1674_p8), [#allocation3], 4294967168  ;;  %s778_s5 = sshll.u32 %s1256_s28, 9  ;;  %s182_s17 = scalar_lea.sflag [#allocation6], %s1256_s28 }
  0x56   : > { %s1262_s4 = scalar_lea.vmem [#allocation5], %s778_s5 }
  0x57   : > { %1059 = dma.done.wait (%p1675_p11), %s182_s17, 8192  }
  0x58   : > { %1061 = vsyncadd (%p1675_p11), %s182_s17, 4294959104  ;;  %v1091_v0 = vmov 0.0   ;;  %v217_v1 = vld [vmem:[%s1262_s4 + $0x8] sm:$0xff]  ;;  %v216_v2 = vld [vmem:[%s1262_s4] sm:$0xff]  ;;  %s1506_s23 = scalar_lea.vmem [#allocation7], %s778_s5  ;;  %s780_s26 = sshll.u32 %s1256_s28, 5 }
  0x59   : > { %345 = vmatprep.mubr.f32.mxu0 %v1091_v0  ;;  %416 = vmatprep.mubr.f32.mxu1 %v1091_v0  ;;  %v221_v3 = vld [vmem:[%s1262_s4 + $0x28] sm:$0xff]  ;;  %v220_v4 = vld [vmem:[%s1262_s4 + $0x20] sm:$0xff]  ;;  %v1273_v6 = vld [vmem:[%s1262_s4 + $0x18] sm:$0xff]  ;;  %s212_s7 = scalar_lea.vmem [#allocation8], %s780_s26  ;;  %s791_s29 = sshll.u32 %s1137_s16, 9 }
  0x5a   : > { %459 = vxpose.xlu1.b32.start [1/16] %v217_v1, 128  ;;  %427 = vxpose.xlu0.b32.start [1/16] %v216_v2, 128  ;;  %v792_v5 = vpack.c.bf16 %v221_v3, %v217_v1  ;;  %v1276_v7 = vld [vmem:[%s1262_s4 + $0x38] sm:$0xff]  ;;  %v1281_v9 = vld [vmem:[%s1262_s4 + $0x10] sm:$0xff]  ;;  %v225_v11 = vld [vmem:[%s1262_s4 + $0x48] sm:$0xff]  ;;  %v794_v12 = vpack.c.bf16 %v220_v4, %v216_v2  ;;  %s655_s10 = sshll.u32 %s212_s7, 4  ;;  %s790_s19 = sshll.u32 %s1137_s16, 13  ;;  %s1570_s10 = int_to_ptr.vmem [resolvable:$true] %s655_s10 }
  0x5b   : > { %v824_v8 = vpack.c.bf16 %v1276_v7, %v1273_v6  ;;  %v1284_v10 = vld [vmem:[%s1262_s4 + $0x30] sm:$0xff]  ;;  %v229_v14 = vld [vmem:[%s1262_s4 + $0x68] sm:$0xff]  ;;  %v224_v15 = vld [vmem:[%s1262_s4 + $0x40] sm:$0xff]  ;;  %s638_s20 = sshll.u32 %s1506_s23, 4  ;;  %s1579_s27 = scalar_lea.hbm %s1657_s3, %s791_s29  ;;  %s1586_s20 = int_to_ptr.vmem [resolvable:$true] %s638_s20 }
  0x5c   : > { %793 = vmatprep.subr.bf16.mxu0 %v792_v5  ;;  %v826_v13 = vpack.c.bf16 %v1284_v10, %v1281_v9  ;;  %v1292_v16 = vld [vmem:[%s1262_s4 + $0x58] sm:$0xff]  ;;  %v796_v17 = vpack.c.bf16 %v229_v14, %v225_v11  ;;  %v1298_v19 = vld [vmem:[%s1262_s4 + $0x50] sm:$0xff]  ;;  %v228_v22 = vld [vmem:[%s1262_s4 + $0x60] sm:$0xff]  ;;  %s1584_s16 = scalar_lea.hbm %s1656_s2, %s790_s19  ;;  %s625_s9 = scalar_lea.sflag [#allocation9], %s1256_s28 }
  0x5d   : > { %825 = vmatprep.subr.bf16.mxu1 %v824_v8  ;;  %795 = vmatpush1.bf16.msra.mxu0 %v794_v12  ;;  %v1295_v18 = vld [vmem:[%s1262_s4 + $0x78] sm:$0xff]  ;;  %v1301_v20 = vld [vmem:[%s1262_s4 + $0x70] sm:$0xff]  ;;  %v233_v23 = vld [vmem:[%s1262_s4 + $0x88] sm:$0xff]  ;;  %v798_v26 = vpack.c.bf16 %v228_v22, %v224_v15  ;;  %s982_s11 = scalar_lea.vmem %s1570_s10, 512  ;;  %p1676_p10 = scmp.ne.s32.totalorder %s1665_s24, 0 }
  0x5e   : > { %460 = vxpose.xlu1.b32.cont [2/16] %v221_v3, 128  ;;  %428 = vxpose.xlu0.b32.cont [2/16] %v220_v4, 128  ;;  %v828_v21 = vpack.c.bf16 %v1295_v18, %v1292_v16  ;;  %v1308_v24 = vld [vmem:[%s1262_s4 + $0xa8] sm:$0xff]  ;;  %v830_v25 = vpack.c.bf16 %v1301_v20, %v1298_v19  ;;  %v1314_v28 = vld [vmem:[%s1262_s4 + $0x98] sm:$0xff]  ;;  %v1320_v30 = vld [vmem:[%s1262_s4 + $0x90] sm:$0xff]  ;;  %p983_p9 = scmp.ne.s32.totalorder %s1570_s10, %s982_s11  ;;  %s1092_s5 = smov [#allocation8]  }
  0x5f   : > { %827 = vmatpush1.bf16.msra.mxu1 %v826_v13  ;;  %797 = vmatprep.subr.bf16.mxu0 %v796_v17  ;;  %v800_v27 = vpack.c.bf16 %v1308_v24, %v233_v23  ;;  %v1317_v29 = vld [vmem:[%s1262_s4 + $0xb8] sm:$0xff]  ;;  %v1325_v32 = vld [vmem:[%s1262_s4 + $0xb0] sm:$0xff]  ;;  %v232_v33 = vld [vmem:[%s1262_s4 + $0x80] sm:$0xff]  ;;  %s986_s17 = sshll.u32 %s1092_s5, 4  ;;  %s987_s17 = int_to_ptr.vmem [resolvable:$false] %s986_s17 }
  0x60   : > { %829 = vmatprep.subr.bf16.mxu1 %v828_v21  ;;  %v832_v31 = vpack.c.bf16 %v1317_v29, %v1314_v28  ;;  %v236_v34 = vld [vmem:[%s1262_s4 + $0xa0] sm:$0xff]  ;;  %v1330_v36 = vld [vmem:[%s1262_s4 + $0xc8] sm:$0xff]  ;;  %v1336_v38 = vld [vmem:[%s1262_s4 + $0xd8] sm:$0xff]  ;;  %v834_v40 = vpack.c.bf16 %v1325_v32, %v1320_v30  ;;  %p984_p2 = pnand %p983_p9, %p1676_p10  ;;  %p989_p5 = scmp.lt.s32.totalorder %s1570_s10, %s987_s17 }
  0x61   : > { %799 = vmatpush1.bf16.msra.mxu0 %v798_v26  ;;  %v802_v35 = vpack.c.bf16 %v236_v34, %v232_v33  ;;  %v1333_v37 = vld [vmem:[%s1262_s4 + $0xe8] sm:$0xff]  ;;  %v1339_v39 = vld [vmem:[%s1262_s4 + $0xf8] sm:$0xff]  ;;  %v1346_v42 = vld [vmem:[%s1262_s4 + $0xd0] sm:$0xff] }
  0x62   : > { %461 = vxpose.xlu1.b32.cont [3/16] %v225_v11, 128  ;;  %429 = vxpose.xlu0.b32.cont [3/16] %v224_v15, 128  ;;  %v804_v41 = vpack.c.bf16 %v1333_v37, %v1330_v36  ;;  %v1349_v43 = vld [vmem:[%s1262_s4 + $0xc0] sm:$0xff]  ;;  %v836_v45 = vpack.c.bf16 %v1339_v39, %v1336_v38  ;;  %v1357_v46 = vld [vmem:[%s1262_s4 + $0xf0] sm:$0xff]  ;;  %v1360_v47 = vld [vmem:[%s1262_s4 + $0x108] sm:$0xff]  ;;  %p985_p4 = pneg %p984_p2 }
  0x63   : > { %831 = vmatpush1.bf16.msra.mxu1 %v830_v25  ;;  %801 = vmatprep.subr.bf16.mxu0 %v800_v27  ;;  %v1352_v44 = vld [vmem:[%s1262_s4 + $0xe0] sm:$0xff]  ;;  %v1363_v48 = vld [vmem:[%s1262_s4 + $0x128] sm:$0xff]  ;;  %v1368_v50 = vld [vmem:[%s1262_s4 + $0x118] sm:$0xff]  ;;  %v838_v54 = vpack.c.bf16 %v1357_v46, %v1346_v42 }
  0x64   : > { %833 = vmatprep.subr.bf16.mxu1 %v832_v31  ;;  %v806_v49 = vpack.c.bf16 %v1352_v44, %v1349_v43  ;;  %v1371_v51 = vld [vmem:[%s1262_s4 + $0x138] sm:$0xff]  ;;  %v1374_v52 = vld [vmem:[%s1262_s4 + $0x100] sm:$0xff]  ;;  %v808_v55 = vpack.c.bf16 %v1363_v48, %v1360_v47  ;;  %v1384_v56 = vld [vmem:[%s1262_s4 + $0x110] sm:$0xff] }
  0x65   : > { %803 = vmatpush1.bf16.msra.mxu0 %v802_v35  ;;  %v1377_v53 = vld [vmem:[%s1262_s4 + $0x120] sm:$0xff]  ;;  %v840_v57 = vpack.c.bf16 %v1371_v51, %v1368_v50  ;;  %v1389_v58 = vld [vmem:[%s1262_s4 + $0x130] sm:$0xff]  ;;  %v1392_v59 = vld [vmem:[%s1262_s4 + $0x148] sm:$0xff] }
  0x66   : > { %462 = vxpose.xlu1.b32.cont [4/16] %v229_v14, 128  ;;  %430 = vxpose.xlu0.b32.cont [4/16] %v228_v22, 128  ;;  %v1395_v60 = vld [vmem:[%s1262_s4 + $0x168] sm:$0xff]  ;;  %v810_v61 = vpack.c.bf16 %v1377_v53, %v1374_v52  ;;  %v1400_v62 = vld [vmem:[%s1262_s4 + $0x158] sm:$0xff]  ;;  %v1406_v0 = vld [vmem:[%s1262_s4 + $0x140] sm:$0xff]  ;;  %v842_v2 = vpack.c.bf16 %v1389_v58, %v1384_v56 }
  0x67   : > { %835 = vmatpush1.bf16.msra.mxu1 %v834_v40  ;;  %805 = vmatprep.subr.bf16.mxu0 %v804_v41  ;;  %v1403_v63 = vld [vmem:[%s1262_s4 + $0x178] sm:$0xff]  ;;  %v1409_v1 = vld [vmem:[%s1262_s4 + $0x160] sm:$0xff]  ;;  %v812_v3 = vpack.c.bf16 %v1395_v60, %v1392_v59  ;;  %v1416_v4 = vld [vmem:[%s1262_s4 + $0x150] sm:$0xff] }
  0x68   : > { %837 = vmatprep.subr.bf16.mxu1 %v836_v45  ;;  %v844_v5 = vpack.c.bf16 %v1403_v63, %v1400_v62  ;;  %v1421_v8 = vld [vmem:[%s1262_s4 + $0x170] sm:$0xff]  ;;  %v265_v11 = vld [vmem:[%s1262_s4 + $0x188] sm:$0xff]  ;;  %v814_v13 = vpack.c.bf16 %v1409_v1, %v1406_v0  ;;  %v1428_v14 = vld [vmem:[%s1262_s4 + $0x198] sm:$0xff] }
  0x69   : > { %807 = vmatpush1.bf16.msra.mxu0 %v806_v49  ;;  %v269_v12 = vld [vmem:[%s1262_s4 + $0x1a8] sm:$0xff]  ;;  %v1431_v15 = vld [vmem:[%s1262_s4 + $0x1b8] sm:$0xff]  ;;  %v264_v17 = vld [vmem:[%s1262_s4 + $0x180] sm:$0xff]  ;;  %v846_v22 = vpack.c.bf16 %v1421_v8, %v1416_v4 }
  0x6a   : > { %463 = vxpose.xlu1.b32.cont [5/16] %v233_v23, 128  ;;  %431 = vxpose.xlu0.b32.cont [5/16] %v232_v33, 128  ;;  %v268_v21 = vld [vmem:[%s1262_s4 + $0x1a0] sm:$0xff]  ;;  %v816_v23 = vpack.c.bf16 %v269_v12, %v265_v11  ;;  %v1439_v25 = vld [vmem:[%s1262_s4 + $0x190] sm:$0xff]  ;;  %v848_v26 = vpack.c.bf16 %v1431_v15, %v1428_v14  ;;  %v273_v27 = vld [vmem:[%s1262_s4 + $0x1c8] sm:$0xff] }
  0x6b   : > { %839 = vmatpush1.bf16.msra.mxu1 %v838_v54  ;;  %809 = vmatprep.subr.bf16.mxu0 %v808_v55  ;;  %v277_v31 = vld [vmem:[%s1262_s4 + $0x1e8] sm:$0xff]  ;;  %v818_v33 = vpack.c.bf16 %v268_v21, %v264_v17  ;;  %v1452_v35 = vld [vmem:[%s1262_s4 + $0x1f8] sm:$0xff]  ;;  %v272_v40 = vld [vmem:[%s1262_s4 + $0x1c0] sm:$0xff] }
  0x6c   : > { %841 = vmatprep.subr.bf16.mxu1 %v840_v57  ;;  %v276_v41 = vld [vmem:[%s1262_s4 + $0x1e0] sm:$0xff]  ;;  %v820_v49 = vpack.c.bf16 %v277_v31, %v273_v27  ;;  %v274_v55 = vld [vmem:[%s1262_s4 + $0x1d0] sm:$0xff] }
  0x6d   : > { %811 = vmatpush1.bf16.msra.mxu0 %v810_v61  ;;  %v278_v57 = vld [vmem:[%s1262_s4 + $0x1f0] sm:$0xff]  ;;  %v822_v61 = vpack.c.bf16 %v276_v41, %v272_v40 }
  0x6e   : > { %464 = vxpose.xlu1.b32.cont [6/16] %v1308_v24, 128  ;;  %432 = vxpose.xlu0.b32.cont [6/16] %v236_v34, 128  ;;  %v1444_v24 = vld [vmem:[%s1262_s4 + $0x1b0] sm:$0xff]  ;;  %v1449_v34 = vld [vmem:[%s1262_s4 + $0x1d8] sm:$0xff]  ;;  %s988_s4 = scalar_lea.vmem %s987_s17, 1024 }
  0x6f   : > { %843 = vmatpush1.bf16.msra.mxu1 %v842_v2  ;;  %813 = vmatprep.subr.bf16.mxu0 %v812_v3  ;;  %v850_v45 = vpack.c.bf16 %v1444_v24, %v1439_v25  ;;  %v852_v54 = vpack.c.bf16 %v1452_v35, %v1449_v34  ;;  %p990_p0 = scmp.lt.s32.totalorder %s988_s4, %s982_s11 }
  0x70   : > { %845 = vmatprep.subr.bf16.mxu1 %v844_v5 }
  0x71   : > { %815 = vmatpush1.bf16.msra.mxu0 %v814_v13  ;;  %p991_p6 = por %p990_p0, %p989_p5 }
  0x72   : > { %465 = vxpose.xlu1.b32.cont [7/16] %v1330_v36, 128  ;;  %433 = vxpose.xlu0.b32.cont [7/16] %v1349_v43, 128  ;;  %v854_v36 = vpack.c.bf16 %v278_v57, %v274_v55  ;;  %v280_v43 = vld [vmem:[#allocation2] sm:$0xff] }
  0x73   : > { %847 = vmatpush1.bf16.msra.mxu1 %v846_v22  ;;  %817 = vmatprep.subr.bf16.mxu0 %v816_v23  ;;  %p992_p13 = pnand %p991_p6, %p985_p4 }
  0x74   : > { %849 = vmatprep.subr.bf16.mxu1 %v848_v26 }
  0x75   : > { %819 = vmatpush1.bf16.msra.mxu0 %v818_v33 }
  0x76   : > { %466 = vxpose.xlu1.b32.cont [8/16] %v1333_v37, 128  ;;  %434 = vxpose.xlu0.b32.cont [8/16] %v1352_v44, 128 }
  0x77   : > { %851 = vmatpush1.bf16.msra.mxu1 %v850_v45  ;;  %821 = vmatprep.subr.bf16.mxu0 %v820_v49 }
  0x78   : > { %853 = vmatprep.subr.bf16.mxu1 %v852_v54 }
  0x79   : > { %823 = vmatpush1.bf16.msra.mxu0 %v822_v61 }
  0x7a   : > { %467 = vxpose.xlu1.b32.cont [9/16] %v1360_v47, 128  ;;  %435 = vxpose.xlu0.b32.cont [9/16] %v1374_v52, 128 }
  0x7b   : > { %855 = vmatpush1.bf16.msra.mxu1 %v854_v36 }
  0x7c   : > { %346 = vmatmul.mubr.f32.vlgmr.msra.gmra.mrb[0].mxu0 %v280_v43 }
  0x7e   : > { %468 = vxpose.xlu1.b32.cont [10/16] %v1363_v48, 128  ;;  %436 = vxpose.xlu0.b32.cont [10/16] %v1377_v53, 128 }
  0x7f   : > { %417 = vmatmul.mubr.f32.vlgmr.msra.gmra.mrb[0].mxu1 %v280_v43 }
  0x82   : > { %469 = vxpose.xlu1.b32.cont [11/16] %v1392_v59, 128  ;;  %437 = vxpose.xlu0.b32.cont [11/16] %v1406_v0, 128 }
  0x86   : > { %470 = vxpose.xlu1.b32.cont [12/16] %v1395_v60, 128  ;;  %438 = vxpose.xlu0.b32.cont [12/16] %v1409_v1, 128 }
  0x8a   : > { %471 = vxpose.xlu1.b32.cont [13/16] %v265_v11, 128  ;;  %439 = vxpose.xlu0.b32.cont [13/16] %v264_v17, 128 }
  0x8e   : > { %472 = vxpose.xlu1.b32.cont [14/16] %v269_v12, 128  ;;  %440 = vxpose.xlu0.b32.cont [14/16] %v268_v21, 128 }
  0x92   : > { %473 = vxpose.xlu1.b32.cont [15/16] %v273_v27, 128  ;;  %441 = vxpose.xlu0.b32.cont [15/16] %v272_v40, 128 }
  0x96   : > { %474 = vxpose.xlu1.b32.end [16/16] %v277_v31, 128  ;;  %442 = vxpose.xlu0.b32.end [16/16] %v276_v41, 128 }
  0x9a   : > { %523 = vxpose.xlu1.b32.start [1/16] %v1273_v6, 128  ;;  %491 = vxpose.xlu0.b32.start [1/16] %v1281_v9, 128 }
  0x9e   : > { %524 = vxpose.xlu1.b32.cont [2/16] %v1276_v7, 128  ;;  %492 = vxpose.xlu0.b32.cont [2/16] %v1284_v10, 128 }
  0xa2   : > { %525 = vxpose.xlu1.b32.cont [3/16] %v1292_v16, 128  ;;  %493 = vxpose.xlu0.b32.cont [3/16] %v1298_v19, 128 }
  0xa6   : > { %526 = vxpose.xlu1.b32.cont [4/16] %v1295_v18, 128  ;;  %494 = vxpose.xlu0.b32.cont [4/16] %v1301_v20, 128 }
  0xaa   : > { %527 = vxpose.xlu1.b32.cont [5/16] %v1314_v28, 128  ;;  %495 = vxpose.xlu0.b32.cont [5/16] %v1320_v30, 128 }
  0xae   : > { %528 = vxpose.xlu1.b32.cont [6/16] %v1317_v29, 128  ;;  %496 = vxpose.xlu0.b32.cont [6/16] %v1325_v32, 128 }
  0xb2   : > { %529 = vxpose.xlu1.b32.cont [7/16] %v1336_v38, 128  ;;  %497 = vxpose.xlu0.b32.cont [7/16] %v1346_v42, 128 }
  0xb6   : > { %530 = vxpose.xlu1.b32.cont [8/16] %v1339_v39, 128  ;;  %498 = vxpose.xlu0.b32.cont [8/16] %v1357_v46, 128 }
  0xba   : > { %531 = vxpose.xlu1.b32.cont [9/16] %v1368_v50, 128  ;;  %499 = vxpose.xlu0.b32.cont [9/16] %v1384_v56, 128 }
  0xbe   : > { %532 = vxpose.xlu1.b32.cont [10/16] %v1371_v51, 128  ;;  %500 = vxpose.xlu0.b32.cont [10/16] %v1389_v58, 128 }
  0xc2   : > { %533 = vxpose.xlu1.b32.cont [11/16] %v1400_v62, 128  ;;  %501 = vxpose.xlu0.b32.cont [11/16] %v1416_v4, 128 }
  0xc6   : > { %534 = vxpose.xlu1.b32.cont [12/16] %v1403_v63, 128  ;;  %502 = vxpose.xlu0.b32.cont [12/16] %v1421_v8, 128 }
  0xca   : > { %535 = vxpose.xlu1.b32.cont [13/16] %v1428_v14, 128  ;;  %503 = vxpose.xlu0.b32.cont [13/16] %v1439_v25, 128 }
  0xce   : > { %536 = vxpose.xlu1.b32.cont [14/16] %v1431_v15, 128  ;;  %504 = vxpose.xlu0.b32.cont [14/16] %v1444_v24, 128 }
  0xd2   : > { %537 = vxpose.xlu1.b32.cont [15/16] %v1449_v34, 128  ;;  %505 = vxpose.xlu0.b32.cont [15/16] %v274_v55, 128 }
  0xd6   : > { %538 = vxpose.xlu1.b32.end [16/16] %v1452_v35, 128  ;;  %506 = vxpose.xlu0.b32.end [16/16] %v278_v57, 128 }
  0xda   : > { %v475_v6 = vpop.trf.xlu1  ;;  %v443_v7 = vpop.trf.xlu0 }
  0xdb   : > { %571 = vst [vmem:[%s1506_s23 + $0x80] sm:$0xff] %v475_v6  ;;  %555 = vst [vmem:[%s1506_s23] sm:$0xff] %v443_v7 }
  0xde   : > { %v476_v9 = vpop.trf.xlu1  ;;  %v444_v10 = vpop.trf.xlu0 }
  0xdf   : > { %572 = vst [vmem:[%s1506_s23 + $0x88] sm:$0xff] %v476_v9  ;;  %556 = vst [vmem:[%s1506_s23 + $0x8] sm:$0xff] %v444_v10 }
  0xe2   : > { %v477_v16 = vpop.trf.xlu1  ;;  %v445_v18 = vpop.trf.xlu0 }
  0xe3   : > { %573 = vst [vmem:[%s1506_s23 + $0x90] sm:$0xff] %v477_v16  ;;  %557 = vst [vmem:[%s1506_s23 + $0x10] sm:$0xff] %v445_v18 }
  0xe6   : > { %v478_v19 = vpop.trf.xlu1  ;;  %v446_v20 = vpop.trf.xlu0 }
  0xe7   : > { %574 = vst [vmem:[%s1506_s23 + $0x98] sm:$0xff] %v478_v19  ;;  %558 = vst [vmem:[%s1506_s23 + $0x18] sm:$0xff] %v446_v20 }
  0xea   : > { %v479_v28 = vpop.trf.xlu1  ;;  %v447_v29 = vpop.trf.xlu0 }
  0xeb   : > { %575 = vst [vmem:[%s1506_s23 + $0xa0] sm:$0xff] %v479_v28  ;;  %559 = vst [vmem:[%s1506_s23 + $0x20] sm:$0xff] %v447_v29 }
  0xee   : > { %v480_v30 = vpop.trf.xlu1  ;;  %v448_v32 = vpop.trf.xlu0 }
  0xef   : > { %576 = vst [vmem:[%s1506_s23 + $0xa8] sm:$0xff] %v480_v30  ;;  %560 = vst [vmem:[%s1506_s23 + $0x28] sm:$0xff] %v448_v32 }
  0xf2   : > { %v481_v37 = vpop.trf.xlu1  ;;  %v449_v38 = vpop.trf.xlu0 }
  0xf3   : > { %577 = vst [vmem:[%s1506_s23 + $0xb0] sm:$0xff] %v481_v37  ;;  %561 = vst [vmem:[%s1506_s23 + $0x30] sm:$0xff] %v449_v38 }
  0xf6   : > { %v482_v39 = vpop.trf.xlu1  ;;  %v450_v42 = vpop.trf.xlu0 }
  0xf7   : > { %578 = vst [vmem:[%s1506_s23 + $0xb8] sm:$0xff] %v482_v39  ;;  %562 = vst [vmem:[%s1506_s23 + $0x38] sm:$0xff] %v450_v42 }
  0xfa   : > { %v483_v44 = vpop.trf.xlu1  ;;  %v451_v46 = vpop.trf.xlu0 }
  0xfb   : > { %579 = vst [vmem:[%s1506_s23 + $0xc0] sm:$0xff] %v483_v44  ;;  %563 = vst [vmem:[%s1506_s23 + $0x40] sm:$0xff] %v451_v46 }
  0xfe   : > { %v484_v47 = vpop.trf.xlu1  ;;  %v452_v48 = vpop.trf.xlu0 }
  0xff   : > { %580 = vst [vmem:[%s1506_s23 + $0xc8] sm:$0xff] %v484_v47  ;;  %564 = vst [vmem:[%s1506_s23 + $0x48] sm:$0xff] %v452_v48 }
 0x102   : > { %v485_v50 = vpop.trf.xlu1  ;;  %v453_v51 = vpop.trf.xlu0 }
 0x103   : > { %581 = vst [vmem:[%s1506_s23 + $0xd0] sm:$0xff] %v485_v50  ;;  %565 = vst [vmem:[%s1506_s23 + $0x50] sm:$0xff] %v453_v51 }
 0x106   : > { %v486_v52 = vpop.trf.xlu1  ;;  %v454_v53 = vpop.trf.xlu0 }
 0x107   : > { %582 = vst [vmem:[%s1506_s23 + $0xd8] sm:$0xff] %v486_v52  ;;  %566 = vst [vmem:[%s1506_s23 + $0x58] sm:$0xff] %v454_v53 }
 0x10a   : > { %v487_v56 = vpop.trf.xlu1  ;;  %v455_v58 = vpop.trf.xlu0 }
 0x10b   : > { %583 = vst [vmem:[%s1506_s23 + $0xe0] sm:$0xff] %v487_v56  ;;  %567 = vst [vmem:[%s1506_s23 + $0x60] sm:$0xff] %v455_v58 }
 0x10e   : > { %v488_v59 = vpop.trf.xlu1  ;;  %v456_v60 = vpop.trf.xlu0 }
 0x10f   : > { %584 = vst [vmem:[%s1506_s23 + $0xe8] sm:$0xff] %v488_v59  ;;  %568 = vst [vmem:[%s1506_s23 + $0x68] sm:$0xff] %v456_v60 }
 0x112   : > { %v489_v62 = vpop.trf.xlu1  ;;  %v457_v63 = vpop.trf.xlu0 }
 0x113   : > { %585 = vst [vmem:[%s1506_s23 + $0xf0] sm:$0xff] %v489_v62  ;;  %569 = vst [vmem:[%s1506_s23 + $0x70] sm:$0xff] %v457_v63 }
 0x116   : > { %v490_v0 = vpop.trf.xlu1  ;;  %v458_v1 = vpop.trf.xlu0 }
 0x117   : > { %586 = vst [vmem:[%s1506_s23 + $0xf8] sm:$0xff] %v490_v0  ;;  %570 = vst [vmem:[%s1506_s23 + $0x78] sm:$0xff] %v458_v1 }
 0x11a   : > { %v539_v2 = vpop.trf.xlu1  ;;  %v507_v3 = vpop.trf.xlu0 }
 0x11b   : > { %603 = vst [vmem:[%s1506_s23 + $0x180] sm:$0xff] %v539_v2  ;;  %587 = vst [vmem:[%s1506_s23 + $0x100] sm:$0xff] %v507_v3 }
 0x11e   : > { %v540_v4 = vpop.trf.xlu1  ;;  %v508_v5 = vpop.trf.xlu0 }
 0x11f   : > { %604 = vst [vmem:[%s1506_s23 + $0x188] sm:$0xff] %v540_v4  ;;  %588 = vst [vmem:[%s1506_s23 + $0x108] sm:$0xff] %v508_v5 }
 0x122   : > { %v541_v8 = vpop.trf.xlu1  ;;  %v509_v11 = vpop.trf.xlu0 }
 0x123   : > { %605 = vst [vmem:[%s1506_s23 + $0x190] sm:$0xff] %v541_v8  ;;  %589 = vst [vmem:[%s1506_s23 + $0x110] sm:$0xff] %v509_v11 }
 0x126   : > { %v542_v12 = vpop.trf.xlu1  ;;  %v510_v13 = vpop.trf.xlu0 }
 0x127   : > { %606 = vst [vmem:[%s1506_s23 + $0x198] sm:$0xff] %v542_v12  ;;  %590 = vst [vmem:[%s1506_s23 + $0x118] sm:$0xff] %v510_v13 }
 0x12a   : > { %v543_v14 = vpop.trf.xlu1  ;;  %v511_v15 = vpop.trf.xlu0 }
 0x12b   : > { %607 = vst [vmem:[%s1506_s23 + $0x1a0] sm:$0xff] %v543_v14  ;;  %591 = vst [vmem:[%s1506_s23 + $0x120] sm:$0xff] %v511_v15 }
 0x12e   : > { %v544_v17 = vpop.trf.xlu1  ;;  %v512_v21 = vpop.trf.xlu0 }
 0x12f   : > { %608 = vst [vmem:[%s1506_s23 + $0x1a8] sm:$0xff] %v544_v17  ;;  %592 = vst [vmem:[%s1506_s23 + $0x128] sm:$0xff] %v512_v21 }
 0x132   : > { %v545_v22 = vpop.trf.xlu1  ;;  %v513_v23 = vpop.trf.xlu0 }
 0x133   : > { %609 = vst [vmem:[%s1506_s23 + $0x1b0] sm:$0xff] %v545_v22  ;;  %593 = vst [vmem:[%s1506_s23 + $0x130] sm:$0xff] %v513_v23 }
 0x136   : > { %v546_v25 = vpop.trf.xlu1  ;;  %v514_v26 = vpop.trf.xlu0 }
 0x137   : > { %610 = vst [vmem:[%s1506_s23 + $0x1b8] sm:$0xff] %v546_v25  ;;  %594 = vst [vmem:[%s1506_s23 + $0x138] sm:$0xff] %v514_v26 }
 0x13a   : > { %v547_v24 = vpop.trf.xlu1  ;;  %v515_v27 = vpop.trf.xlu0 }
 0x13b   : > { %611 = vst [vmem:[%s1506_s23 + $0x1c0] sm:$0xff] %v547_v24  ;;  %595 = vst [vmem:[%s1506_s23 + $0x140] sm:$0xff] %v515_v27 }
 0x13e   : > { %v548_v31 = vpop.trf.xlu1  ;;  %v516_v33 = vpop.trf.xlu0 }
 0x13f   : > { %612 = vst [vmem:[%s1506_s23 + $0x1c8] sm:$0xff] %v548_v31  ;;  %596 = vst [vmem:[%s1506_s23 + $0x148] sm:$0xff] %v516_v33 }
 0x142   : > { %v549_v34 = vpop.trf.xlu1  ;;  %v517_v35 = vpop.trf.xlu0 }
 0x143   : > { %613 = vst [vmem:[%s1506_s23 + $0x1d0] sm:$0xff] %v549_v34  ;;  %597 = vst [vmem:[%s1506_s23 + $0x150] sm:$0xff] %v517_v35 }
 0x146   : > { %v550_v40 = vpop.trf.xlu1  ;;  %v518_v41 = vpop.trf.xlu0 }
 0x147   : > { %614 = vst [vmem:[%s1506_s23 + $0x1d8] sm:$0xff] %v550_v40  ;;  %598 = vst [vmem:[%s1506_s23 + $0x158] sm:$0xff] %v518_v41 }
 0x14a   : > { %v551_v45 = vpop.trf.xlu1  ;;  %v519_v49 = vpop.trf.xlu0 }
 0x14b   : > { %615 = vst [vmem:[%s1506_s23 + $0x1e0] sm:$0xff] %v551_v45  ;;  %599 = vst [vmem:[%s1506_s23 + $0x160] sm:$0xff] %v519_v49 }
 0x14e   : > { %v552_v54 = vpop.trf.xlu1  ;;  %v520_v55 = vpop.trf.xlu0 }
 0x14f   : > { %616 = vst [vmem:[%s1506_s23 + $0x1e8] sm:$0xff] %v552_v54  ;;  %600 = vst [vmem:[%s1506_s23 + $0x168] sm:$0xff] %v520_v55  ;;  %v347_v57 = vpop.f32.mrb[0].mxu0 }
 0x150   : > { %423 = vst [vmem:[%s212_s7] sm:$0xff] %v347_v57  ;;  %v349_v61 = vpop.f32.mrb[1].mxu0 }
 0x151   : > { %424 = vst [vmem:[%s212_s7 + $0x8] sm:$0xff] %v349_v61 }
 0x152   : > { %v553_v36 = vpop.trf.xlu1  ;;  %v521_v43 = vpop.trf.xlu0 }
 0x153   : > { %617 = vst [vmem:[%s1506_s23 + $0x1f0] sm:$0xff] %v553_v36  ;;  %601 = vst [vmem:[%s1506_s23 + $0x170] sm:$0xff] %v521_v43  ;;  %v418_v6 = vpop.f32.mrb[0].mxu1 }
 0x154   : > { %425 = vst [vmem:[%s212_s7 + $0x10] sm:$0xff] %v418_v6  ;;  %v420_v7 = vpop.f32.mrb[1].mxu1 }
 0x155   : > { %426 = vst [vmem:[%s212_s7 + $0x18] sm:$0xff] %v420_v7 }
 0x156   : > { %v554_v9 = vpop.trf.xlu1  ;;  %v522_v10 = vpop.trf.xlu0 }
 0x157   : > { %995 = shalt.err (!%p992_p13)
}
 0x158   : > { %s996_s26 = scalar_lea.hbm %s1579_s27, 512  ;;  %s1000_s19 = scalar_lea.hbm %s1657_s3, 1024 }
 0x159   : > { %p997_p7 = scmp.ne.s32.totalorder %s1579_s27, %s996_s26  ;;  %p1001_p1 = scmp.lt.u32.totalorder %s1579_s27, %s1657_s3 }
 0x15a   : > { %p1002_p8 = scmp.lt.u32.totalorder %s1000_s19, %s996_s26  ;;  %p1004_p9 = scmp.lt.u32.totalorder %s996_s26, %s1579_s27 }
 0x15b   : > { %p998_p3 = pnand %p997_p7, %p1676_p10 }
 0x15c   : > { %p1003_p11 = por %p1002_p8, %p1001_p1 }
 0x15d   : > { %p999_p12 = pneg %p998_p3 }
 0x15e   : > { %p1005_p2 = por %p1004_p9, %p1003_p11 }
 0x160   : > { %p1006_p4 = pnand %p1005_p2, %p999_p12 }
 0x162   : > { %1009 = shalt.err (!%p1006_p4)
}
 0x163   : > { %863 = dma.vmem_to_hbm [thread:$0]  (%p1676_p10), %s1570_s10, 512, %s1579_s27, %s625_s9   ;;  %618 = vst [vmem:[%s1506_s23 + $0x1f8] sm:$0xff] %v554_v9  ;;  %602 = vst [vmem:[%s1506_s23 + $0x178] sm:$0xff] %v522_v10 }
 0x164   : > { %s620_s6 = scalar_lea.sflag [#allocation4], %s1256_s28  ;;  %s1010_s8 = scalar_lea.vmem %s1586_s20, 8192 }
 0x165   : > { %p1011_p5 = scmp.ne.s32.totalorder %s1586_s20, %s1010_s8  ;;  %s1093_s11 = smov [#allocation7]  }
 0x166   : > { %s1014_s5 = sshll.u32 %s1093_s11, 4  ;;  %s1015_s5 = int_to_ptr.vmem [resolvable:$false] %s1014_s5 }
 0x167   : > { %p1012_p0 = pnand %p1011_p5, %p1676_p10  ;;  %s1016_s17 = scalar_lea.vmem %s1015_s5, 16384 }
 0x168   : > { %p1017_p13 = scmp.lt.s32.totalorder %s1586_s20, %s1015_s5  ;;  %p1018_p7 = scmp.lt.s32.totalorder %s1016_s17, %s1010_s8 }
 0x169   : > { %p1013_p6 = pneg %p1012_p0 }
 0x16a   : > { %p1019_p3 = por %p1018_p7, %p1017_p13 }
 0x16c   : > { %p1020_p12 = pnand %p1019_p3, %p1013_p6 }
 0x16e   : > { %1023 = shalt.err (!%p1020_p12)
}
 0x16f   : > { %s1024_s23 = scalar_lea.hbm %s1584_s16, 8192  ;;  %s1028_s9 = scalar_lea.hbm %s1656_s2, 16384 }
 0x170   : > { %p1025_p1 = scmp.ne.s32.totalorder %s1584_s16, %s1024_s23  ;;  %p1029_p9 = scmp.lt.u32.totalorder %s1584_s16, %s1656_s2 }
 0x171   : > { %p1030_p2 = scmp.lt.u32.totalorder %s1028_s9, %s1024_s23  ;;  %p1032_p5 = scmp.lt.u32.totalorder %s1024_s23, %s1584_s16 }
 0x172   : > { %p1026_p8 = pnand %p1025_p1, %p1676_p10 }
 0x173   : > { %p1031_p4 = por %p1030_p2, %p1029_p9 }
 0x174   : > { %p1027_p11 = pneg %p1026_p8 }
 0x175   : > { %p1033_p0 = por %p1032_p5, %p1031_p4 }
 0x177   : > { %p1034_p6 = pnand %p1033_p0, %p1027_p11 }
 0x179   : > { %1037 = shalt.err (!%p1034_p6)
}
 0x17a   : > { %s1094_s7 = smov 128   ;;  %s1095_s29 = smov 8  }
 0x17b   : > { %862 = dma.vmem_to_hbm [thread:$0]  (%p1676_p10), %s1586_s20, 8192, %s1584_s16, %s620_s6, %s1094_s7, %s1094_s7, %s1095_s29  }
 0x17c PF: > { %s667_s19 = sand.u32 1, %s1072_s12   ;;  %p1677_p13 = scmp.ne.s32.totalorder %s1666_s25, 0 }
 0x17d   : > { %p1678_p7 = scmp.ge.s32.totalorder %s1084_s15, 2  ;;  %s668_s30 = scalar_lea.sflag [#allocation4], %s667_s19 }
 0x17f   : > { %p875_p3 = pnand %p1678_p7, %p1677_p13 }
 0x181   : > { %1063 = dma.done.wait (!%p875_p3), %s668_s30, 8192  }
 0x182   : > { %1065 = vsyncadd (!%p875_p3), %s668_s30, 4294959104  ;;  %s677_s22 = scalar_lea.sflag [#allocation9], %s667_s19 }
 0x183   : > { %1067 = dma.done.wait (!%p875_p3), %s677_s22, 512  }
 0x184   : > { %1069 = vsyncadd (!%p875_p3), %s677_s22, 4294966784  ;;  %p21_p10 = scmp.ge.s32.totalorder %s1141_s18, 4   ;;  %s1679_s12 = smov %s1076_s13 }
 0x185   : > { %s1680_s13 = smov %s1080_s14  ;;  %s1681_s14 = smov %s1153_s21 }
 0x186   : > { %s1682_s15 = smov %s1141_s18  ;;  %23 = sbr.rel (!%p21_p10) target bundleno = 8 (0x8), region = 95 }
 0x18d   :  { %682 = vsyncpa [#allocation3], 1 }
 0x18e   :  { %684 = vsyncpa [#allocation3 + $0x1], 1 }
 0x18f   :  { %685 = vsyncpa [#allocation6], 1 }
 0x190   :  { %687 = vsyncpa [#allocation6 + $0x1], 1 }
 0x191   :  { %688 = vsyncpa [#allocation4], 1 }
 0x192   :  { %690 = vsyncpa [#allocation4 + $0x1], 1 }
 0x193   :  { %691 = vsyncpa [#allocation9], 1 }
 0x194   :  { %693 = vsyncpa [#allocation9 + $0x1], 1 }

</bundles_post_ra>
